<compile_context>
chip_gen: v6e
topology: v6e:2x2x1
jax: 0.10.0
libtpu: 0.0.40
codegen_flags: <defaults>
</compile_context>

<pallas_src>
import functools

import jax
import jax.numpy as jnp
from jax import lax
from jax.experimental import pallas as pl
from jax.experimental.pallas import tpu as pltpu

LANE = 128
SUBLANES = 8          # f32 sublane tile
MAX_TILE_ROWS = 2048  # (2048, 128) f32 = 1 MiB / input / buffer
NCORES = 2            # megacore split (no-op on single-TC chips)


def _min_sublanes(dtype):
    """Sublane granularity for the input dtype (8 f32, 16 bf16, 32 int8/fp8)."""
    itemsize = jnp.dtype(dtype).itemsize
    return max(SUBLANES, 32 // max(itemsize, 1))


def _make_l1_kernel(tile_rows, rows_valid, total_blocks, steps_per_core):
    """Build an L1-sum kernel with the (static) geometry baked in."""
    last_block_rows = rows_valid - (total_blocks - 1) * tile_rows
    need_row_mask = last_block_rows != tile_rows

    def kernel(a_ref, p_ref, o_ref):
        core = pl.program_id(0)
        step = pl.program_id(1)
        logical_blk = core * steps_per_core + step

        # Zero this core's resident (8, 128) partial-sum slab once.
        @pl.when(step == 0)
        def _():
            o_ref[...] = jnp.zeros_like(o_ref)

        # Skip compute for grid slots beyond the real block count (their DMA
        # was clamped onto a valid block; accumulating would double count).
        @pl.when(logical_blk < total_blocks)
        def _():
            a = a_ref[...].astype(jnp.float32)
            p = p_ref[...].astype(jnp.float32)
            absdiff = jnp.abs(a - p)

            if need_row_mask:
                # Partial last block: zero out rows past the valid range
                # (OOB-padded block contents are unspecified).
                row = logical_blk * tile_rows + lax.broadcasted_iota(
                    jnp.int32, (tile_rows, LANE), 0)
                absdiff = jnp.where(row < rows_valid, absdiff,
                                    jnp.float32(0.0))

            # Fold (tile_rows, 128) -> (8, 128) with VPU adds across vregs;
            # the single cross-lane collapse happens in the wrapper.
            folded = jnp.sum(
                absdiff.reshape(tile_rows // SUBLANES, SUBLANES, LANE), axis=0)
            o_ref[...] += folded

    return kernel


def pixel_loss(actual, pred, reduction="mean"):
    """JAX/Pallas equivalent of PixelLoss.forward (nn.L1Loss)."""
    if actual.shape != pred.shape:
        raise Exception("Unable to process the input")
    n = actual.size

    a_flat = actual.reshape(-1)
    p_flat = pred.reshape(-1)

    align = LANE * _min_sublanes(actual.dtype)
    n_main = (n // align) * align

    total = jnp.float32(0.0)

    if n_main > 0:
        rows = n_main // LANE                       # multiple of >=8
        tile_rows = min(MAX_TILE_ROWS, rows)        # multiple of >=8
        total_blocks = pl.cdiv(rows, tile_rows)
        steps_per_core = pl.cdiv(total_blocks, NCORES)

        a2d = a_flat[:n_main].reshape(rows, LANE)
        p2d = p_flat[:n_main].reshape(rows, LANE)

        def in_map(c, i):
            blk = c * steps_per_core + i
            # Clamp slots past the real block count onto a valid block
            # (compute for them is gated off inside the kernel).
            return (jnp.minimum(blk, total_blocks - 1), 0)

        partials = pl.pallas_call(
            _make_l1_kernel(tile_rows, rows, total_blocks, steps_per_core),
            out_shape=jax.ShapeDtypeStruct((NCORES * SUBLANES, LANE),
                                           jnp.float32),
            grid_spec=pltpu.PrefetchScalarGridSpec(
                num_scalar_prefetch=0,
                grid=(NCORES, steps_per_core),
                in_specs=[
                    pl.BlockSpec((tile_rows, LANE), in_map),
                    pl.BlockSpec((tile_rows, LANE), in_map),
                ],
                out_specs=pl.BlockSpec((SUBLANES, LANE), lambda c, i: (c, 0)),
            ),
            compiler_params=pltpu.CompilerParams(
                dimension_semantics=("parallel", "arbitrary")),
        )(a2d, p2d)
        total = total + jnp.sum(partials)

    if n_main < n:
        # Ragged tail (< one lane-aligned slab): tiny plain-JAX reduction
        # instead of padding + copying the whole array in HBM.
        a_tail = a_flat[n_main:].astype(jnp.float32)
        p_tail = p_flat[n_main:].astype(jnp.float32)
        total = total + jnp.sum(jnp.abs(a_tail - p_tail))

    if reduction == "mean":
        return total / jnp.float32(n)
    elif reduction == "sum":
        return total
    else:
        raise ValueError(f"unsupported reduction: {reduction}")


if __name__ == "__main__":
    key = jax.random.PRNGKey(0)
    k1, k2, k3, k4 = jax.random.split(key, 4)

    loss_mean = jax.jit(functools.partial(pixel_loss, reduction="mean"))

    # Primary test: NCHW [2, 4, 16, 16] (image-style pixel loss).
    actual = jax.random.normal(k1, (2, 4, 16, 16), dtype=jnp.float32)
    pred = jax.random.normal(k2, (2, 4, 16, 16), dtype=jnp.float32)
    loss = loss_mean(actual, pred)
    jax.block_until_ready(loss)
    ref = jnp.mean(jnp.abs(actual - pred))
    assert jnp.allclose(loss, ref, rtol=1e-5, atol=1e-6), (loss, ref)

    # Ragged shape exercising the plain-JAX tail path.
    a2 = jax.random.normal(k3, (2, 3, 17, 19), dtype=jnp.float32)
    p2 = jax.random.normal(k4, (2, 3, 17, 19), dtype=jnp.float32)
    loss2 = loss_mean(a2, p2)
    jax.block_until_ready(loss2)
    ref2 = jnp.mean(jnp.abs(a2 - p2))
    assert jnp.allclose(loss2, ref2, rtol=1e-5, atol=1e-6), (loss2, ref2)

    print("KERNEL_OK")
</pallas_src>

<mosaic_0001>
module attributes {stable_mosaic.version = 11 : i64} {
  func.func @kernel(%arg0: i32, %arg1: i32, %arg2: memref<16x128xf32, #tpu.memory_space<vmem>>, %arg3: memref<16x128xf32, #tpu.memory_space<vmem>>, %arg4: memref<8x128xf32, #tpu.memory_space<vmem>>) attributes {dimension_semantics = [#tpu.dimension_semantics<parallel>, #tpu.dimension_semantics<arbitrary>], iteration_bounds = array<i64: 2, 1>, scalar_prefetch = 0 : i64, scratch_operands = 0 : i64, tpu.core_type = #tpu.core_type<tc>, window_params = [{transform_indices = @transform_0, window_bounds = array<i64: 16, 128>}, {transform_indices = @transform_1, window_bounds = array<i64: 16, 128>}, {transform_indices = @transform_2, window_bounds = array<i64: 8, 128>}]} {
    %c1_i32 = arith.constant 1 : i32
    %0 = arith.muli %arg0, %c1_i32 : i32
    %1 = arith.addi %0, %arg1 : i32
    %c0_i32 = arith.constant 0 : i32
    %2 = arith.cmpi eq, %arg1, %c0_i32 : i32
    %3 = arith.extui %2 : i1 to i32
    %c0_i32_0 = arith.constant 0 : i32
    %4 = arith.cmpi ne, %3, %c0_i32_0 : i32
    scf.if %4 {
      %cst = arith.constant 0.000000e+00 : f32
      %8 = vector.broadcast %cst : f32 to vector<8x128xf32>
      %c0 = arith.constant 0 : index
      %c0_3 = arith.constant 0 : index
      %9 = vector.load %arg4[%c0, %c0_3] : memref<8x128xf32, #tpu.memory_space<vmem>>, vector<8x128xf32>
      tpu.vector_store %arg4[%c0, %c0_3], %8 {strides = array<i32>} : memref<8x128xf32, #tpu.memory_space<vmem>>, vector<8x128xf32>,
    } else {
    }
    %c1_i32_1 = arith.constant 1 : i32
    %5 = arith.cmpi slt, %1, %c1_i32_1 : i32
    %6 = arith.extui %5 : i1 to i32
    %c0_i32_2 = arith.constant 0 : i32
    %7 = arith.cmpi ne, %6, %c0_i32_2 : i32
    scf.if %7 {
      %c0 = arith.constant 0 : index
      %c0_3 = arith.constant 0 : index
      %8 = vector.load %arg2[%c0, %c0_3] : memref<16x128xf32, #tpu.memory_space<vmem>>, vector<16x128xf32>
      %c0_4 = arith.constant 0 : index
      %c0_5 = arith.constant 0 : index
      %9 = vector.load %arg3[%c0_4, %c0_5] : memref<16x128xf32, #tpu.memory_space<vmem>>, vector<16x128xf32>
      %10 = arith.subf %8, %9 : vector<16x128xf32>
      %11 = math.absf %10 : vector<16x128xf32>
      %12 = vector.shape_cast %11 : vector<16x128xf32> to vector<2x8x128xf32>
      %cst = arith.constant dense<0.000000e+00> : vector<8x128xf32>
      %13 = vector.multi_reduction <add>, %12, %cst [0] : vector<2x8x128xf32> to vector<8x128xf32>
      %c0_6 = arith.constant 0 : index
      %c0_7 = arith.constant 0 : index
      %14 = vector.load %arg4[%c0_6, %c0_7] : memref<8x128xf32, #tpu.memory_space<vmem>>, vector<8x128xf32>
      %15 = arith.addf %14, %13 : vector<8x128xf32>
      %c0_8 = arith.constant 0 : index
      %c0_9 = arith.constant 0 : index
      %16 = vector.load %arg4[%c0_8, %c0_9] : memref<8x128xf32, #tpu.memory_space<vmem>>, vector<8x128xf32>
      tpu.vector_store %arg4[%c0_8, %c0_9], %15 {strides = array<i32>} : memref<8x128xf32, #tpu.memory_space<vmem>>, vector<8x128xf32>,
    } else {
    }
    return
  }
  func.func @transform_0(%arg0: i32, %arg1: i32) -> (i32, i32) {
    %c1_i32 = arith.constant 1 : i32
    %0 = arith.muli %arg0, %c1_i32 : i32
    %1 = arith.addi %0, %arg1 : i32
    %c0_i32 = arith.constant 0 : i32
    %2 = arith.minsi %1, %c0_i32 : i32
    %c0_i32_0 = arith.constant 0 : i32
    %c0_i32_1 = arith.constant 0 : i32
    return %2, %c0_i32_0 : i32, i32
  }
  func.func @transform_1(%arg0: i32, %arg1: i32) -> (i32, i32) {
    %c1_i32 = arith.constant 1 : i32
    %0 = arith.muli %arg0, %c1_i32 : i32
    %1 = arith.addi %0, %arg1 : i32
    %c0_i32 = arith.constant 0 : i32
    %2 = arith.minsi %1, %c0_i32 : i32
    %c0_i32_0 = arith.constant 0 : i32
    %c0_i32_1 = arith.constant 0 : i32
    return %2, %c0_i32_0 : i32, i32
  }
  func.func @transform_2(%arg0: i32, %arg1: i32) -> (i32, i32) {
    %c0_i32 = arith.constant 0 : i32
    %c0_i32_0 = arith.constant 0 : i32
    return %arg0, %c0_i32 : i32, i32
  }
}

</mosaic_0001>

<bundles_post_ra>
// kernel: pixel_loss.1
= control target key start
LH: loop header
LB: loop body
LE: loop exit
PB: predicated region body
PF: predicated region fallthrough
CT: control target
= control target key end

     0   :  { %s393_s9 = smov 0   ;;  %s395_s10 = smov 0   ;;  %s429_s0 = inlined_call_operand.vmem [shape: f32[16,128], index: 0, kind: input, shape index: {}]   ;;  %s430_s1 = inlined_call_operand.vmem [shape: f32[16,128], index: 1, kind: input, shape index: {}]   ;;  %s431_s2 = inlined_call_operand.vmem [shape: f32[16,128], index: 2, kind: output, shape index: {}]  }
   0x1   :  { %s397_s11 = smov 0  }
   0x2 LB: > { %s24_s12 = sadd.s32 1, %s371_s10  ;;  %p319_p0 = scmp.ge.s32.totalorder %s375_s11, 1  ;;  %s375_s11 = sphi %s397_s11, %s12_s11   ;;  %s371_s10 = sphi %s395_s10, %s433_s10   ;;  %s367_s9 = sphi %s393_s9, %s432_s9  }
   0x3   : > { %p26_p1 = scmp.ge.s32.totalorder %s24_s12, 2  ;;  %p160_p2 = scmp.lt.s32.totalorder %s375_s11, 3 }
   0x5   : > { %s435_s12 = smov (%p26_p1, %s24_s12), 0  ;;  %p161_p3 = pnand %p319_p0, %p160_p2 }
   0x6   : > { %p193_p4 = scmp.lt.s32.totalorder (!%p161_p3), %s367_s9, 0  ;;  %p216_p5 = scmp.lt.s32.totalorder (!%p161_p3), %s367_s9, 1 }
   0x7   : > { %164 = sbr.rel (%p161_p3) target bundleno = 32 (0x20), region = 28  ;;  %p325_p7 = scmp.ge.s32.totalorder (!%p161_p3), %s367_s9, 1 }
   0xc   : > { %s194_s13 = scalar_select %p193_p4, %s367_s9, 0  ;;  %v377_v0 = vmov 0.0  }
   0xd   : > { %s217_s14 = scalar_select %p216_p5, %s367_s9, 1 }
   0xe   : > { %s320_s15 = sshll.u32 %s194_s13, 1 }
   0xf   : > { %p196_p6 = scmp.lt.s32.totalorder %s320_s15, 1  ;;  %s324_s16 = sshll.u32 %s217_s14, 3 }
  0x10   : > { %s219_s19 = scalar_lea.vmem %s431_s2, %s324_s16  ;;  %229 = sbr.rel (%p325_p7) target bundleno = 32 (0x20), region = 36 }
  0x11   : > { %s437_s15 = smov (!%p196_p6, %s320_s15), 1  ;;  %225 = vst [vmem:[%s219_s19] sm:$0xff] %v377_v0 }
  0x12   : > { %s321_s20 = sshll.u32 %s437_s15, 3 }
  0x13   : > { %s199_s23 = scalar_lea.vmem %s429_s0, %s321_s20  ;;  %s211_s26 = scalar_lea.vmem %s430_s1, %s321_s20 }
  0x15   : > { %v230_v1 = vld [vmem:[%s199_s23] sm:$0xff]  ;;  %v231_v2 = vld [vmem:[%s199_s23 + $0x8] sm:$0xff] }
  0x16   : > { %v232_v3 = vld [vmem:[%s211_s26] sm:$0xff]  ;;  %v233_v4 = vld [vmem:[%s211_s26 + $0x8] sm:$0xff] }
  0x17   : > { %v234_v5 = vsub.f32 %v230_v1, %v232_v3  ;;  %v235_v6 = vsub.f32 %v231_v2, %v233_v4 }
  0x18   : > { %v239_v9 = vld [vmem:[%s219_s19] sm:$0xff] }
  0x19   : > { %v236_v7 = vand.u32 2147483647, %v234_v5  ;;  %v237_v8 = vand.u32 2147483647, %v235_v6 }
  0x1b   : > { %v238_v10 = vadd.f32 %v237_v8, %v236_v7 }
  0x1d   : > { %v240_v11 = vadd.f32 %v239_v9, %v238_v10 }
  0x1f   : > { %241 = vst [vmem:[%s219_s19] sm:$0xff] %v240_v11 }
  0x20 PF: > { %s12_s11 = sadd.s32 1, %s375_s11   ;;  %s432_s9 = smov %s371_s10 }
  0x21   : > { %p9_p8 = scmp.ge.s32.totalorder %s12_s11, 4   ;;  %s433_s10 = smov %s435_s12 }
  0x23   :  { %11 = sbr.rel (!%p9_p8) target bundleno = 2 (0x2), region = 69 }

</bundles_post_ra>
